<compile_context>
chip_gen: v7x
topology: tpu7x:2x2x1
jax: 0.10.0
libtpu: 0.0.40
codegen_flags: <defaults>
</compile_context>

<pallas_src>
import functools

import jax
import jax.numpy as jnp
import numpy as np
from jax.experimental import pallas as pl
from jax.experimental.pallas import tpu as pltpu

_LANES = 128


def _round_up(a: int, b: int) -> int:
    return (a + b - 1) // b * b


def _fused_ffn_kernel(x_ref, w1_ref, b1_ref, w2_ref, b2_ref, o_ref):
    """Fused (im2col-conv) GEMM -> bias -> ReLU -> GEMM -> bias.

    x_ref : (tM, K*Cin)     im2col'd activations for this M-tile
    w1_ref: (K*Cin, Ch)     conv weight, tap-major, flattened over (tap, Cin)
    b1_ref: (1, Ch)         conv bias (f32)
    w2_ref: (Ch, N_pad)     linear weight, transposed + zero-padded to 128 lanes
    b2_ref: (1, N_pad)      linear bias, zero-padded (f32)
    o_ref : (tM, N_pad)     lane-dense output tile
    """
    # Conv1d as a single im2col matmul (one MXU pass instead of K tap matmuls).
    h = jnp.dot(x_ref[...], w1_ref[...], preferred_element_type=jnp.float32)
    # Bias + ReLU in f32 on the VPU.
    h = jnp.maximum(h + b1_ref[...], 0.0)
    # TODO(synk): training-mode dropout (pltpu.prng_seed / prng_random_bits mask)
    # is not implemented; nn.Dropout is identity in eval mode.
    out = jnp.dot(h.astype(w2_ref.dtype), w2_ref[...],
                  preferred_element_type=jnp.float32)
    o_ref[...] = (out + b2_ref[...]).astype(o_ref.dtype)


def prepare_conv1d_linear_params(w_conv, b_conv, w_lin, b_lin, *,
                                 compute_dtype=jnp.float32):
    """One-time parameter layout prep (hoisted out of the per-call path).

    Args:
      w_conv: (K, Cin, Ch) conv1d weight, tap-major channels-last
              (= torch Conv1d weight (Ch, Cin, K) permuted to (K, Cin, Ch)).
      b_conv: (Ch,)
      w_lin:  (Cin, Ch)    torch nn.Linear(hidden_chans, in_chans) weight (out, in).
      b_lin:  (Cin,)
      compute_dtype: dtype of the matmul inputs (f32 or bf16); accumulation is
                     always f32, biases/ReLU stay f32.
    """
    K, Cin, Ch = w_conv.shape
    n_pad = _round_up(Cin, _LANES)  # lane-dense output width
    w1 = w_conv.reshape(K * Cin, Ch).astype(compute_dtype)
    b1 = b_conv.reshape(1, Ch).astype(jnp.float32)
    w2 = jnp.pad(w_lin.T, ((0, 0), (0, n_pad - Cin))).astype(compute_dtype)
    b2 = jnp.pad(b_lin, (0, n_pad - Cin)).reshape(1, n_pad).astype(jnp.float32)
    return dict(w1=w1, b1=b1, w2=w2, b2=b2,
                kernel_size=K, in_chans=Cin, hidden_chans=Ch,
                n_pad=n_pad, compute_dtype=compute_dtype)


def conv1d_linear(x, params, *, m_tile_cap: int = 512):
    """Forward pass of Conv1dLinear (eval mode).

    Args:
      x: (B, T, Cin) activations.
      params: output of prepare_conv1d_linear_params().
    Returns:
      (B, T_out, Cin) with T_out = T + 2*((K-1)//2) - K + 1 (== T for odd K).
    """
    B, T, Cin = x.shape
    K = params["kernel_size"]
    Ch = params["hidden_chans"]
    n_pad = params["n_pad"]
    cdt = params["compute_dtype"]
    assert Cin == params["in_chans"]

    pad = (K - 1) // 2
    T_out = T + 2 * pad - K + 1
    KC = K * Cin

    # im2col: fold the K-tap halo into the lane axis and batch+time into the GEMM
    # M dimension, so the kernel never slices/shifts and never runs a per-batch grid.
    x_pad = jnp.pad(x, ((0, 0), (pad, pad), (0, 0)))
    x_col = jnp.concatenate([x_pad[:, j:j + T_out, :] for j in range(K)], axis=-1)
    x_col = x_col.reshape(B * T_out, KC).astype(cdt)

    M = B * T_out
    # Pick an M tile: <= m_tile_cap rows, sublane-aligned, and >=2 grid steps when
    # the problem allows (keeps both v7x TensorCores busy).
    tm = min(m_tile_cap, max(8, _round_up(pl.cdiv(M, 2), 8)))
    m_padded = _round_up(M, tm)
    if m_padded != M:
        x_col = jnp.pad(x_col, ((0, m_padded - M), (0, 0)))
    grid_m = m_padded // tm

    out = pl.pallas_call(
        _fused_ffn_kernel,
        out_shape=jax.ShapeDtypeStruct((m_padded, n_pad), x.dtype),
        grid_spec=pltpu.PrefetchScalarGridSpec(
            num_scalar_prefetch=0,
            grid=(grid_m,),
            in_specs=[
                pl.BlockSpec((tm, KC), lambda m: (m, 0)),      # activations (tiled)
                pl.BlockSpec((KC, Ch), lambda m: (0, 0)),      # conv weight
                pl.BlockSpec((1, Ch), lambda m: (0, 0)),       # conv bias
                pl.BlockSpec((Ch, n_pad), lambda m: (0, 0)),   # linear weight (padded)
                pl.BlockSpec((1, n_pad), lambda m: (0, 0)),    # linear bias (padded)
            ],
            out_specs=pl.BlockSpec((tm, n_pad), lambda m: (m, 0)),
        ),
        compiler_params=pltpu.CompilerParams(
            dimension_semantics=("parallel",)),
    )(x_col, params["w1"], params["b1"], params["w2"], params["b2"])

    return out[:M, :Cin].reshape(B, T_out, Cin)


def _reference(x, w_conv, b_conv, w_lin, b_lin, kernel_size):
    """Plain-JAX reference mirroring the PyTorch module (eval mode)."""
    B, T, Cin = x.shape
    K = kernel_size
    pad = (K - 1) // 2
    x_pad = jnp.pad(x, ((0, 0), (pad, pad), (0, 0)))
    T_out = T + 2 * pad - K + 1
    h = b_conv[None, None, :]
    for j in range(K):
        h = h + jnp.einsum("btc,ch->bth", x_pad[:, j:j + T_out, :], w_conv[j])
    h = jnp.maximum(h, 0.0)
    return jnp.einsum("bth,oh->bto", h, w_lin) + b_lin[None, None, :]


if __name__ == "__main__":
    # Module hyper-params (small / synthetic).
    in_chans, hidden_chans, kernel_size, dropout_rate = 4, 32, 3, 0.0
    B, T = 2, 16

    key = jax.random.PRNGKey(0)
    kx, kw1, kb1, kw2, kb2 = jax.random.split(key, 5)

    x = jax.random.normal(kx, (B, T, in_chans), dtype=jnp.float32)
    # Conv1d weight in tap-major channels-last layout (K, Cin, Ch).
    w_conv = jax.random.normal(kw1, (kernel_size, in_chans, hidden_chans),
                               dtype=jnp.float32) * 0.1
    b_conv = jax.random.normal(kb1, (hidden_chans,), dtype=jnp.float32) * 0.1
    # nn.Linear(hidden_chans, in_chans): weight (out=in_chans, in=hidden_chans).
    w_lin = jax.random.normal(kw2, (in_chans, hidden_chans),
                              dtype=jnp.float32) * 0.1
    b_lin = jax.random.normal(kb2, (in_chans,), dtype=jnp.float32) * 0.1

    ref = _reference(x, w_conv, b_conv, w_lin, b_lin, kernel_size)

    # f32 compute path (exact check).
    params_f32 = prepare_conv1d_linear_params(
        w_conv, b_conv, w_lin, b_lin, compute_dtype=jnp.float32)
    out_f32 = jax.block_until_ready(conv1d_linear(x, params_f32))
    np.testing.assert_allclose(np.asarray(out_f32), np.asarray(ref),
                               rtol=1e-5, atol=1e-5)

    # bf16-input / f32-accumulate path (v6e / v7x MXU-friendly), loose check.
    params_bf16 = prepare_conv1d_linear_params(
        w_conv, b_conv, w_lin, b_lin, compute_dtype=jnp.bfloat16)
    out_bf16 = jax.block_until_ready(conv1d_linear(x, params_bf16))
    np.testing.assert_allclose(np.asarray(out_bf16), np.asarray(ref),
                               rtol=5e-2, atol=5e-2)

    print("KERNEL_OK")
</pallas_src>

<mosaic_0001>
module attributes {stable_mosaic.version = 11 : i64} {
  func.func @_fused_ffn_kernel(%arg0: i32, %arg1: memref<16x12xf32, #tpu.memory_space<vmem>>, %arg2: memref<12x32xf32, #tpu.memory_space<vmem>>, %arg3: memref<1x32xf32, #tpu.memory_space<vmem>>, %arg4: memref<32x128xf32, #tpu.memory_space<vmem>>, %arg5: memref<1x128xf32, #tpu.memory_space<vmem>>, %arg6: memref<16x128xf32, #tpu.memory_space<vmem>>) attributes {dimension_semantics = [#tpu.dimension_semantics<parallel>], iteration_bounds = array<i64: 2>, scalar_prefetch = 0 : i64, scratch_operands = 0 : i64, tpu.core_type = #tpu.core_type<tc>, window_params = [{transform_indices = @transform_0, window_bounds = array<i64: 16, 12>}, {pipeline_mode = #tpu.pipeline_mode<synchronous>, transform_indices = @transform_1, window_bounds = array<i64: 12, 32>}, {pipeline_mode = #tpu.pipeline_mode<synchronous>, transform_indices = @transform_2, window_bounds = array<i64: 1, 32>}, {pipeline_mode = #tpu.pipeline_mode<synchronous>, transform_indices = @transform_3, window_bounds = array<i64: 32, 128>}, {pipeline_mode = #tpu.pipeline_mode<synchronous>, transform_indices = @transform_4, window_bounds = array<i64: 1, 128>}, {transform_indices = @transform_5, window_bounds = array<i64: 16, 128>}]} {
    %c0 = arith.constant 0 : index
    %c0_0 = arith.constant 0 : index
    %0 = vector.load %arg1[%c0, %c0_0] : memref<16x12xf32, #tpu.memory_space<vmem>>, vector<16x12xf32>
    %c0_1 = arith.constant 0 : index
    %c0_2 = arith.constant 0 : index
    %1 = vector.load %arg2[%c0_1, %c0_2] : memref<12x32xf32, #tpu.memory_space<vmem>>, vector<12x32xf32>
    %cst = arith.constant dense<0.000000e+00> : vector<16x32xf32>
    %2 = tpu.matmul %0, %1, %cst {dimension_numbers = #tpu.dot_dimension_numbers<[1], [0], [0], [1], [0, 0, 1, 1], [], []>} : vector<16x12xf32>, vector<12x32xf32>, vector<16x32xf32> -> vector<16x32xf32>
    %c0_3 = arith.constant 0 : index
    %c0_4 = arith.constant 0 : index
    %3 = vector.load %arg3[%c0_3, %c0_4] : memref<1x32xf32, #tpu.memory_space<vmem>>, vector<1x32xf32>
    %4 = vector.broadcast %3 : vector<1x32xf32> to vector<16x32xf32>
    %5 = arith.addf %2, %4 : vector<16x32xf32>
    %cst_5 = arith.constant 0.000000e+00 : f32
    %6 = vector.broadcast %cst_5 : f32 to vector<16x32xf32>
    %7 = arith.maximumf %5, %6 : vector<16x32xf32>
    %c0_6 = arith.constant 0 : index
    %c0_7 = arith.constant 0 : index
    %8 = vector.load %arg4[%c0_6, %c0_7] : memref<32x128xf32, #tpu.memory_space<vmem>>, vector<32x128xf32>
    %cst_8 = arith.constant dense<0.000000e+00> : vector<16x128xf32>
    %9 = tpu.matmul %7, %8, %cst_8 {dimension_numbers = #tpu.dot_dimension_numbers<[1], [0], [0], [1], [0, 0, 1, 1], [], []>} : vector<16x32xf32>, vector<32x128xf32>, vector<16x128xf32> -> vector<16x128xf32>
    %c0_9 = arith.constant 0 : index
    %c0_10 = arith.constant 0 : index
    %10 = vector.load %arg5[%c0_9, %c0_10] : memref<1x128xf32, #tpu.memory_space<vmem>>, vector<1x128xf32>
    %11 = vector.broadcast %10 : vector<1x128xf32> to vector<16x128xf32>
    %12 = arith.addf %9, %11 : vector<16x128xf32>
    %c0_11 = arith.constant 0 : index
    %c0_12 = arith.constant 0 : index
    %13 = vector.load %arg6[%c0_11, %c0_12] : memref<16x128xf32, #tpu.memory_space<vmem>>, vector<16x128xf32>
    tpu.vector_store %arg6[%c0_11, %c0_12], %12 {strides = array<i32>} : memref<16x128xf32, #tpu.memory_space<vmem>>, vector<16x128xf32>,
    return
  }
  func.func @transform_0(%arg0: i32) -> (i32, i32) {
    %c0_i32 = arith.constant 0 : i32
    %c0_i32_0 = arith.constant 0 : i32
    return %arg0, %c0_i32 : i32, i32
  }
  func.func @transform_1(%arg0: i32) -> (i32, i32) {
    %c0_i32 = arith.constant 0 : i32
    %c0_i32_0 = arith.constant 0 : i32
    %c0_i32_1 = arith.constant 0 : i32
    return %c0_i32, %c0_i32_0 : i32, i32
  }
  func.func @transform_2(%arg0: i32) -> (i32, i32) {
    %c0_i32 = arith.constant 0 : i32
    %c0_i32_0 = arith.constant 0 : i32
    %c0_i32_1 = arith.constant 0 : i32
    return %c0_i32, %c0_i32_0 : i32, i32
  }
  func.func @transform_3(%arg0: i32) -> (i32, i32) {
    %c0_i32 = arith.constant 0 : i32
    %c0_i32_0 = arith.constant 0 : i32
    %c0_i32_1 = arith.constant 0 : i32
    return %c0_i32, %c0_i32_0 : i32, i32
  }
  func.func @transform_4(%arg0: i32) -> (i32, i32) {
    %c0_i32 = arith.constant 0 : i32
    %c0_i32_0 = arith.constant 0 : i32
    %c0_i32_1 = arith.constant 0 : i32
    return %c0_i32, %c0_i32_0 : i32, i32
  }
  func.func @transform_5(%arg0: i32) -> (i32, i32) {
    %c0_i32 = arith.constant 0 : i32
    %c0_i32_0 = arith.constant 0 : i32
    return %arg0, %c0_i32 : i32, i32
  }
}

</mosaic_0001>

<bundles_post_ra>
// kernel: tpu_custom_call.1
= control target key start
LH: loop header
LB: loop body
LE: loop exit
PB: predicated region body
PF: predicated region fallthrough
CT: control target
= control target key end

     0   :  { %10 = vsyncpa [#allocation3], 0  ;;  %s824_s0 = inlined_call_operand.vmem [shape: f32[32,12], index: 0, kind: input, shape index: {}]   ;;  %s825_s1 = inlined_call_operand.vmem [shape: f32[12,32], index: 1, kind: input, shape index: {}]   ;;  %s826_s2 = inlined_call_operand.vmem [shape: f32[1,32], index: 2, kind: input, shape index: {}]   ;;  %s827_s3 = inlined_call_operand.vmem [shape: f32[32,128], index: 3, kind: input, shape index: {}]   ;;  %s828_s4 = inlined_call_operand.vmem [shape: f32[1,128], index: 4, kind: input, shape index: {}]   ;;  %s829_s5 = inlined_call_operand.hbm [shape: f32[32,128], index: 5, kind: output, shape index: {}]  }
   0x1   :  { %12 = vsyncpa [#allocation3 + $0x1], 0  ;;  %s698_s18 = smov 0   ;;  %s700_s19 = smov 0  }
   0x2   :  { %s702_s20 = smov 0   ;;  %s704_s21 = smov 0  }
   0x3 LB: > { %s719_s22 = sadd.s32 4294967295, %s662_s21   ;;  %s496_s23 = sadd.s32 4294967294, %s662_s21   ;;  %s662_s21 = sphi %s704_s21, %s835_s21   ;;  %s658_s20 = sphi %s702_s20, %s834_s20   ;;  %s654_s19 = sphi %s700_s19, %s833_s19   ;;  %s650_s18 = sphi %s698_s18, %s832_s18  }
   0x4   : > { %s723_s24 = sadd.s32 1, %s662_s21   ;;  %s135_s25 = sadd.s32 1, %s658_s20 }
   0x5   : > { %s132_s26 = ssub.s32 %s662_s21, %s723_s24  ;;  %p145_p0 = scmp.ne.s32.totalorder %s658_s20, %s654_s19 }
   0x6   : > { %p133_p1 = scmp.eq.s32.totalorder %s132_s26, 0  ;;  %p146_p2 = scmp.eq.s32.totalorder %s719_s22, 1 }
   0x7   : > { %p151_p3 = scmp.ne.s32.totalorder %s654_s19, %s650_s18  ;;  %p152_p4 = scmp.eq.s32.totalorder %s496_s23, 1 }
   0x8   : > { %s734_s27 = scalar_select %p133_p1, %s658_s20, %s135_s25  }
   0x9   : > { %p736_p5 = por %p146_p2, %p145_p0  ;;  %p740_p6 = por %p152_p4, %p151_p3 }
   0xa   : > { %p499_p7 = scmp.ge.s32.totalorder %s662_s21, 1  ;;  %p191_p8 = scmp.lt.s32.totalorder %s662_s21, 3 }
   0xc   : > { %p192_p9 = pnand %p499_p7, %p191_p8 }
   0xd   : > { %v228_v0 = vld [vmem:[%s825_s1] sm:$0xff] (!%p192_p9)  ;;  %v229_v1 = vld [vmem:[%s825_s1 + $0x8] sm:$0xf] (!%p192_p9)  ;;  %vm244_vm0 = vcmask (!%p192_p9), 1043456   ;;  %s501_s9 = sshll.u32 (!%p192_p9), %s719_s22, 1  ;;  %vm664_vm1 = vmmov (!%p192_p9), 1  }
   0xe   : > { %195 = sbr.rel (%p192_p9) target bundleno = 474 (0x1da), region = 40  ;;  %v544_v2 = vpack.c.bf16 (!%p192_p9), %v229_v1, %v228_v0  ;;  %vm545_vm2 = vmpackc.low (!%p192_p9), %vm244_vm0, %vm664_vm1  ;;  %p220_p10 = scmp.lt.s32.totalorder (!%p192_p9), %s501_s9, 3  ;;  %v325_v3 = vld [vmem:[%s827_s3] sm:$0xff] (!%p192_p9)  ;;  %v326_v4 = vld [vmem:[%s827_s3 + $0x8] sm:$0xff] (!%p192_p9)  ;;  %vm237_vm3 = vcmask (!%p192_p9), 97280   ;;  %vm336_vm4 = vcmask (!%p192_p9), 261120  }
   0xf   : > { %v550_v5 = vpack.c.bf16 (!%p192_p9), %v326_v4, %v325_v3  ;;  %v327_v8 = vld [vmem:[%s827_s3 + $0x10] sm:$0xff] (!%p192_p9)  ;;  %v328_v9 = vld [vmem:[%s827_s3 + $0x18] sm:$0xff] (!%p192_p9)  ;;  %v503_v11 = vld [vmem:[%s826_s2] ss:$0 sm:$0xff] (!%p192_p9)  ;;  %s216_s8 = sand.u32 (!%p192_p9), 1, %s654_s19  }
  0x10   : > { %546 = vmatprep.subr.msk.bf16.mxu0 (!%p192_p9), %vm545_vm2, %v544_v2  ;;  %v554_v10 = vpack.c.bf16 (!%p192_p9), %v328_v9, %v327_v8  ;;  %v507_v18 = vld [vmem:[%s828_s4] ss:$0 sm:$0xff] (!%p192_p9)  ;;  %s783_s23 = scalar_lea.sflag (!%p192_p9), [#allocation3], %s216_s8 }
  0x11   : > { %549 = vmatpush3.bf16.msk.msra.mxu0 (!%p192_p9), %vm545_vm2, %v544_v2  ;;  %551 = vmatprep.subr.bf16.mxu1 (!%p192_p9), %v550_v5 }
  0x12   : > { %553 = vmatpush3.bf16.msra.mxu1 (!%p192_p9), %v550_v5 }
  0x13   : > { %555 = vmatprep.subr.bf16.mxu1 (!%p192_p9), %v554_v10 }
  0x15   : > { %s837_s9 = smov (!%p220_p10, %s501_s9), 3 }
  0x16   : > { %s502_s14 = sshll.u32 %s837_s9, 3  ;;  %557 = vmatpush3.bf16.msra.mxu1 %v554_v10  ;;  %s500_s9 = sshll.u32 %s216_s8, 4 }
  0x17   : > { %s223_s17 = scalar_lea.vmem %s824_s0, %s502_s14  ;;  %s218_s12 = scalar_lea.vmem [#allocation2], %s500_s9 }
  0x18   : > { %v226_v6 = vld [vmem:[%s223_s17] sm:$0xff]  ;;  %v227_v7 = vld [vmem:[%s223_s17 + $0x8] sm:$0xff]  ;;  %s434_s13 = sshll.u32 %s218_s12, 4  ;;  %s515_s14 = sshll.u32 %s719_s22, 8  ;;  %s776_s13 = int_to_ptr.vmem [resolvable:$true] %s434_s13 }
  0x19   : > { %530 = vmatprep.mubr.msk.f32.mxu0 %vm237_vm3, %v226_v6  ;;  %s781_s17 = scalar_lea.hbm %s829_s5, %s515_s14  ;;  %s600_s25 = scalar_lea.vmem %s776_s13, 256 }
  0x1a   : > { %531 = vmatmul.mubr.msk.f32.vlgmr.msra.gmra.mrb[0].mxu0 %vm237_vm3, %v227_v7  ;;  %p601_p11 = scmp.ne.s32.totalorder %s776_s13, %s600_s25  ;;  %s665_s22 = smov [#allocation2]  }
  0x1b   : > { %s604_s26 = sshll.u32 %s665_s22, 4  ;;  %s605_s26 = int_to_ptr.vmem [resolvable:$false] %s604_s26 }
  0x1c   : > { %p602_p12 = pnand %p601_p11, %p736_p5  ;;  %s606_s30 = scalar_lea.vmem %s605_s26, 512 }
  0x1d   : > { %p607_p0 = scmp.lt.s32.totalorder %s776_s13, %s605_s26  ;;  %p608_p1 = scmp.lt.s32.totalorder %s606_s30, %s600_s25 }
  0x1e   : > { %p603_p13 = pneg %p602_p12 }
  0x1f   : > { %p609_p2 = por %p608_p1, %p607_p0 }
  0x21   : > { %p610_p3 = pnand %p609_p2, %p603_p13 }
  0xed   : > { %v532_v12 = vpop.f32.mrb[0].mxu0 }
  0xee   : > { %v320_v13 = vadd.f32 %v532_v12, %v503_v11  ;;  %v314_v14 = vpop.f32.mrb[1].mxu0 }
  0xef   : > { %v315_v15 = vadd.f32 %v503_v11, %v314_v14 }
  0xf0   : > { %v324_v17 = vmax.f32 %v320_v13, 0.0 }
  0xf1   : > { %v323_v16 = vmax.f32 %v315_v15, 0.0 }
  0xf3   : > { %541 = vmatprep.mubr.msk.f32.mxu1 %vm336_vm4, %v323_v16 }
  0xf4   : > { %542 = vmatmul.mubr.msk.f32.vlgmr.msra.gmra.mrb[0].mxu1 %vm336_vm4, %v324_v17 }
 0x1c7   : > { %v543_v19 = vpop.f32.mrb[0].mxu1 }
 0x1c8   : > { %v415_v20 = vadd.f32 %v543_v19, %v507_v18  ;;  %v409_v21 = vpop.f32.mrb[1].mxu1 }
 0x1c9   : > { %v410_v22 = vadd.f32 %v507_v18, %v409_v21 }
 0x1ca   : > { %419 = vst [vmem:[%s218_s12 + $0x8] sm:$0xff] %v415_v20 }
 0x1cb   : > { %418 = vst [vmem:[%s218_s12] sm:$0xff] %v410_v22 }
 0x1cc   : > { %613 = shalt.err (!%p610_p3)
}
 0x1cd   : > { %s614_s6 = scalar_lea.hbm %s781_s17, 256  ;;  %s618_s9 = scalar_lea.hbm %s829_s5, 512 }
 0x1ce   : > { %p615_p4 = scmp.ne.s32.totalorder %s781_s17, %s614_s6  ;;  %p619_p9 = scmp.lt.u32.totalorder %s781_s17, %s829_s5 }
 0x1cf   : > { %p620_p10 = scmp.lt.u32.totalorder %s618_s9, %s614_s6  ;;  %p622_p12 = scmp.lt.u32.totalorder %s614_s6, %s781_s17 }
 0x1d0   : > { %p616_p7 = pnand %p615_p4, %p736_p5 }
 0x1d1   : > { %p621_p11 = por %p620_p10, %p619_p9 }
 0x1d2   : > { %p617_p8 = pneg %p616_p7 }
 0x1d3   : > { %p623_p13 = por %p622_p12, %p621_p11 }
 0x1d5   : > { %p624_p0 = pnand %p623_p13, %p617_p8 }
 0x1d7   : > { %627 = shalt.err (!%p624_p0)
}
 0x1d8   : > { %s666_s12 = smov 128   ;;  %s667_s14 = smov 8  }
 0x1d9   : > { %558 = dma.vmem_to_hbm [thread:$0]  (%p736_p5), %s776_s13, 256, %s781_s17, %s783_s23, %s666_s12, %s666_s12, %s667_s14  }
 0x1da PF: > { %p564_p1 = scmp.ge.s32.totalorder %s662_s21, 2  ;;  %s449_s15 = sand.u32 1, %s650_s18  }
 0x1db   : > { %s450_s16 = scalar_lea.sflag [#allocation3], %s449_s15 }
 0x1dc   : > { %p561_p2 = pnand %p564_p1, %p740_p6 }
 0x1de   : > { %645 = dma.done.wait (!%p561_p2), %s450_s16, 256  }
 0x1df   : > { %647 = vsyncadd (!%p561_p2), %s450_s16, 4294967040  ;;  %p15_p3 = scmp.ge.s32.totalorder %s723_s24, 4   ;;  %s832_s18 = smov %s654_s19 }
 0x1e0   : > { %s833_s19 = smov %s658_s20  ;;  %s834_s20 = smov %s734_s27 }
 0x1e1   : > { %s835_s21 = smov %s723_s24  ;;  %17 = sbr.rel (!%p15_p3) target bundleno = 3 (0x3), region = 75 }
 0x1e8   :  { %455 = vsyncpa [#allocation3], 1 }
 0x1e9   :  { %457 = vsyncpa [#allocation3 + $0x1], 1 }

</bundles_post_ra>
